<compile_context>
chip_gen: v6e
topology: v6e:2x2x1
jax: 0.10.0
libtpu: 0.0.40
codegen_flags: <defaults>
</compile_context>

<pallas_src>
import functools

import jax
import jax.numpy as jnp
from jax.experimental import pallas as pl
from jax.experimental.pallas import tpu as pltpu


def _round_up(a: int, m: int) -> int:
    return (a + m - 1) // m * m


# ---------------------------------------------------------------------------
# Pallas kernel: one (batch, row-strip, filter) block of the masked depthwise
# 3x3 conv, then clamp(-128, 127) and XQuantize (round).
# ---------------------------------------------------------------------------
def _depthwise_kernel(x_ref, w_ref, o_ref, *, C: int, TH: int):
    # x_ref: (TH + 2, W*C)  input rows of one strip, W-major / C-minor on lanes
    # w_ref: (9, W*C)       the 9 taps (t = p*3 + q) of one masked filter,
    #                       pre-tiled along W so they broadcast on lanes
    # o_ref: (TH, W*C)      clamped + rounded output rows (lane-dense, bf16)
    WC = x_ref.shape[-1]
    acc = None
    for p in range(3):
        # row shift: sublane-offset view load from the resident strip
        xp = x_ref[pl.ds(p, TH), :]                            # (TH, W*C)
        for q in range(3):
            # column shift: lane rotation by q*C (XLU slot).  Wrapped lanes
            # land in the right margin that the wrapper crops away.
            xq = xp if q == 0 else pltpu.roll(xp, shift=WC - q * C, axis=1)
            wt = w_ref[pl.ds(p * 3 + q, 1), :]                 # (1, W*C)
            term = xq * wt
            acc = term if acc is None else acc + term          # 1st tap inits acc
    # clamp then XQuantize(round) -- same ordering as the PyTorch module
    o_ref[...] = jnp.round(jnp.clip(acc, -128.0, 127.0)).astype(o_ref.dtype)


# ---------------------------------------------------------------------------
# Wrapper: layout plumbing + pallas_call
# ---------------------------------------------------------------------------
def _build_strips(x, TH):
    """x: (B, H, W*C). Returns (B, S, TH+2, W*C) row strips with a 2-row halo."""
    B, H, WC = x.shape
    Ho = H - 2
    S = -(-Ho // TH)                       # cdiv
    H_need = S * TH + 2
    if H_need > H:
        x = jnp.pad(x, ((0, 0), (0, H_need - H), (0, 0)))
    if S == 1:
        return x[:, None, :, :]
    # TODO(synk): for very large images replace this wrapper-side halo-strip
    # materialization (one extra input copy) with in-kernel halo DMA.
    return jnp.stack([x[:, s * TH:s * TH + TH + 2, :] for s in range(S)], axis=1)


def depthwise9(x_nchw, weights, masks, *, th_max=64, out_dtype=jnp.float32):
    """9 masked depthwise 3x3 convs + clamp(-128,127) + round.

    x_nchw:  (B, C, H, W)
    weights: (9, C, 3, 3)   masks: (9, C, 3, 3)
    Returns one stacked array (9, B, C, H-2, W-2).
    """
    B, C, H, W = x_nchw.shape
    Ho, Wo = H - 2, W - 2
    WC = W * C

    # lane-dense input layout: NCHW -> NHWC -> (B, H, W*C)
    x = jnp.transpose(x_nchw.astype(jnp.float32), (0, 2, 3, 1)).reshape(B, H, WC)

    # output row-strip height (multiple of 8, bounded so tiles fit v7x VMEM)
    TH = min(th_max, _round_up(Ho, 8))
    xs = _build_strips(x, TH)                                  # (B, S, TH+2, WC)
    S = xs.shape[1]

    # masked filters, taps flattened and tiled along W: (9, 9, W*C)
    wm = (weights * masks).astype(jnp.float32)                 # (9, C, 3, 3)
    w = jnp.transpose(wm, (0, 2, 3, 1)).reshape(9, 9, C)       # (9, taps, C)
    w = jnp.broadcast_to(w[:, :, None, :], (9, 9, W, C)).reshape(9, 9, WC)

    kernel = functools.partial(_depthwise_kernel, C=C, TH=TH)
    out = pl.pallas_call(
        kernel,
        out_shape=jax.ShapeDtypeStruct((9, B, S, TH, WC), jnp.bfloat16),
        grid=(B, S, 9),                    # filter axis innermost -> strip stays resident
        in_specs=[
            pl.BlockSpec((None, None, TH + 2, WC), lambda b, s, k: (b, s, 0, 0)),
            pl.BlockSpec((None, 9, WC), lambda b, s, k: (k, 0, 0)),
        ],
        out_specs=pl.BlockSpec((None, None, None, TH, WC),
                               lambda b, s, k: (k, b, s, 0, 0)),
        compiler_params=pltpu.CompilerParams(
            dimension_semantics=("parallel", "parallel", "parallel")),
    )(xs, w)

    # single fused crop / cast / transpose back to stacked NCHW
    out = out.reshape(9, B, S * TH, W, C)[:, :, :Ho, :Wo, :]
    out = jnp.transpose(out.astype(out_dtype), (0, 1, 4, 2, 3))  # (9,B,C,Ho,Wo)
    return out


# ---------------------------------------------------------------------------
# Module mirror (forward-only)
# ---------------------------------------------------------------------------
class DepthWisePallas:
    def __init__(self, key, channels=16):
        kh, mh, kl, ml = jax.random.split(key, 4)
        C = channels
        self.weight_h = jax.random.normal(kh, (9, C, 3, 3), jnp.float32) * 0.1
        self.mask_h = (jax.random.uniform(mh, (9, C, 3, 3)) > 0.5).astype(jnp.float32)
        self.weight_l = jax.random.normal(kl, (9, C, 3, 3), jnp.float32) * 0.1
        self.mask_l = (jax.random.uniform(ml, (9, C, 3, 3)) > 0.5).astype(jnp.float32)

    def forward(self, xh, xl, h=True):
        # PyTorch computes both branches and returns one; computing only the
        # selected branch gives the identical returned value.
        if h:
            out = depthwise9(xh, self.weight_h, self.mask_h)
        else:
            out = depthwise9(xl, self.weight_l, self.mask_l)
        return [out[k] for k in range(9)]
        # TODO(synk): XQuantize straight-through-estimator backward not modeled
        # (forward-only kernel).


# ---------------------------------------------------------------------------
# Pure-JAX reference (mirrors F.conv2d(groups=C) + clamp + round)
# ---------------------------------------------------------------------------
def depthwise9_reference(x_nchw, weights, masks):
    x = x_nchw.astype(jnp.float32)
    wm = (weights * masks).astype(jnp.float32)
    B, C, H, W = x.shape
    Ho, Wo = H - 2, W - 2
    outs = []
    for k in range(9):
        acc = None
        for p in range(3):
            for q in range(3):
                term = x[:, :, p:p + Ho, q:q + Wo] * wm[k, :, p, q][None, :, None, None]
                acc = term if acc is None else acc + term
        outs.append(jnp.round(jnp.clip(acc, -128.0, 127.0)))
    return outs


# ---------------------------------------------------------------------------
if __name__ == "__main__":
    key = jax.random.PRNGKey(0)
    pkey, xkey = jax.random.split(key)

    B, C, H, W = 2, 16, 8, 8                 # module fixes channels at 16
    model = DepthWisePallas(pkey, channels=C)

    img = jnp.round(jax.random.uniform(xkey, (B, C, H, W), jnp.float32, 0.0, 255.0))
    xl = jnp.remainder(img, 4.0)
    xh = jnp.floor_divide(img, 4.0)

    # high path
    out_h = model.forward(xh, xl, h=True)
    out_h = [o.block_until_ready() for o in out_h]
    assert len(out_h) == 9 and out_h[0].shape == (B, C, H - 2, W - 2)

    # low path
    out_l = model.forward(xh, xl, h=False)
    out_l = [o.block_until_ready() for o in out_l]
    assert len(out_l) == 9 and out_l[0].shape == (B, C, H - 2, W - 2)

    # correctness vs. plain-JAX reference
    ref_h = depthwise9_reference(xh, model.weight_h, model.mask_h)
    ref_l = depthwise9_reference(xl, model.weight_l, model.mask_l)
    max_diff = 0.0
    for a, b in zip(out_h + out_l, ref_h + ref_l):
        max_diff = max(max_diff, float(jnp.max(jnp.abs(a - b))))
    assert max_diff <= 1e-3, f"depthwise kernel mismatch: {max_diff}"
    assert all(bool(jnp.all(jnp.isfinite(o))) for o in out_h + out_l)

    print("KERNEL_OK")
</pallas_src>

<mosaic_0001>
module attributes {stable_mosaic.version = 11 : i64} {
  func.func @_depthwise_kernel(%arg0: i32, %arg1: i32, %arg2: i32, %arg3: memref<1x1x10x128xf32, #tpu.memory_space<vmem>>, %arg4: memref<1x9x128xf32, #tpu.memory_space<vmem>>, %arg5: memref<1x1x1x8x128xbf16, #tpu.memory_space<vmem>>) attributes {dimension_semantics = [#tpu.dimension_semantics<parallel>, #tpu.dimension_semantics<parallel>, #tpu.dimension_semantics<parallel>], iteration_bounds = array<i64: 2, 1, 9>, scalar_prefetch = 0 : i64, scratch_operands = 0 : i64, tpu.core_type = #tpu.core_type<tc>, window_params = [{transform_indices = @transform_0, window_bounds = array<i64: 1, 1, 10, 128>}, {transform_indices = @transform_1, window_bounds = array<i64: 1, 9, 128>}, {transform_indices = @transform_2, window_bounds = array<i64: 1, 1, 1, 8, 128>}]} {
    %c0 = arith.constant 0 : index
    %c0_0 = arith.constant 0 : index
    %c0_1 = arith.constant 0 : index
    %c0_2 = arith.constant 0 : index
    %0 = vector.load %arg3[%c0, %c0_0, %c0_1, %c0_2] : memref<1x1x10x128xf32, #tpu.memory_space<vmem>>, vector<1x1x8x128xf32>
    %1 = vector.shape_cast %0 : vector<1x1x8x128xf32> to vector<8x128xf32>
    %c0_3 = arith.constant 0 : index
    %c0_4 = arith.constant 0 : index
    %c0_5 = arith.constant 0 : index
    %2 = vector.load %arg4[%c0_3, %c0_4, %c0_5] : memref<1x9x128xf32, #tpu.memory_space<vmem>>, vector<1x1x128xf32>
    %3 = vector.shape_cast %2 : vector<1x1x128xf32> to vector<1x128xf32>
    %4 = vector.broadcast %3 : vector<1x128xf32> to vector<8x128xf32>
    %5 = arith.mulf %1, %4 : vector<8x128xf32>
    %c112_i32 = arith.constant 112 : i32
    %6 = tpu.dynamic_rotate %1 by %c112_i32 dim 1 : vector<8x128xf32>, i32 -> vector<8x128xf32>
    %c0_6 = arith.constant 0 : index
    %c1 = arith.constant 1 : index
    %c0_7 = arith.constant 0 : index
    %7 = vector.load %arg4[%c0_6, %c1, %c0_7] : memref<1x9x128xf32, #tpu.memory_space<vmem>>, vector<1x1x128xf32>
    %8 = vector.shape_cast %7 : vector<1x1x128xf32> to vector<1x128xf32>
    %9 = vector.broadcast %8 : vector<1x128xf32> to vector<8x128xf32>
    %10 = arith.mulf %6, %9 : vector<8x128xf32>
    %11 = arith.addf %5, %10 : vector<8x128xf32>
    %c96_i32 = arith.constant 96 : i32
    %12 = tpu.dynamic_rotate %1 by %c96_i32 dim 1 : vector<8x128xf32>, i32 -> vector<8x128xf32>
    %c0_8 = arith.constant 0 : index
    %c2 = arith.constant 2 : index
    %c0_9 = arith.constant 0 : index
    %13 = vector.load %arg4[%c0_8, %c2, %c0_9] : memref<1x9x128xf32, #tpu.memory_space<vmem>>, vector<1x1x128xf32>
    %14 = vector.shape_cast %13 : vector<1x1x128xf32> to vector<1x128xf32>
    %15 = vector.broadcast %14 : vector<1x128xf32> to vector<8x128xf32>
    %16 = arith.mulf %12, %15 : vector<8x128xf32>
    %17 = arith.addf %11, %16 : vector<8x128xf32>
    %c0_10 = arith.constant 0 : index
    %c0_11 = arith.constant 0 : index
    %c1_12 = arith.constant 1 : index
    %c0_13 = arith.constant 0 : index
    %18 = vector.load %arg3[%c0_10, %c0_11, %c1_12, %c0_13] : memref<1x1x10x128xf32, #tpu.memory_space<vmem>>, vector<1x1x8x128xf32>
    %19 = vector.shape_cast %18 : vector<1x1x8x128xf32> to vector<8x128xf32>
    %c0_14 = arith.constant 0 : index
    %c3 = arith.constant 3 : index
    %c0_15 = arith.constant 0 : index
    %20 = vector.load %arg4[%c0_14, %c3, %c0_15] : memref<1x9x128xf32, #tpu.memory_space<vmem>>, vector<1x1x128xf32>
    %21 = vector.shape_cast %20 : vector<1x1x128xf32> to vector<1x128xf32>
    %22 = vector.broadcast %21 : vector<1x128xf32> to vector<8x128xf32>
    %23 = arith.mulf %19, %22 : vector<8x128xf32>
    %24 = arith.addf %17, %23 : vector<8x128xf32>
    %c112_i32_16 = arith.constant 112 : i32
    %25 = tpu.dynamic_rotate %19 by %c112_i32_16 dim 1 : vector<8x128xf32>, i32 -> vector<8x128xf32>
    %c0_17 = arith.constant 0 : index
    %c4 = arith.constant 4 : index
    %c0_18 = arith.constant 0 : index
    %26 = vector.load %arg4[%c0_17, %c4, %c0_18] : memref<1x9x128xf32, #tpu.memory_space<vmem>>, vector<1x1x128xf32>
    %27 = vector.shape_cast %26 : vector<1x1x128xf32> to vector<1x128xf32>
    %28 = vector.broadcast %27 : vector<1x128xf32> to vector<8x128xf32>
    %29 = arith.mulf %25, %28 : vector<8x128xf32>
    %30 = arith.addf %24, %29 : vector<8x128xf32>
    %c96_i32_19 = arith.constant 96 : i32
    %31 = tpu.dynamic_rotate %19 by %c96_i32_19 dim 1 : vector<8x128xf32>, i32 -> vector<8x128xf32>
    %c0_20 = arith.constant 0 : index
    %c5 = arith.constant 5 : index
    %c0_21 = arith.constant 0 : index
    %32 = vector.load %arg4[%c0_20, %c5, %c0_21] : memref<1x9x128xf32, #tpu.memory_space<vmem>>, vector<1x1x128xf32>
    %33 = vector.shape_cast %32 : vector<1x1x128xf32> to vector<1x128xf32>
    %34 = vector.broadcast %33 : vector<1x128xf32> to vector<8x128xf32>
    %35 = arith.mulf %31, %34 : vector<8x128xf32>
    %36 = arith.addf %30, %35 : vector<8x128xf32>
    %c0_22 = arith.constant 0 : index
    %c0_23 = arith.constant 0 : index
    %c2_24 = arith.constant 2 : index
    %c0_25 = arith.constant 0 : index
    %37 = vector.load %arg3[%c0_22, %c0_23, %c2_24, %c0_25] : memref<1x1x10x128xf32, #tpu.memory_space<vmem>>, vector<1x1x8x128xf32>
    %38 = vector.shape_cast %37 : vector<1x1x8x128xf32> to vector<8x128xf32>
    %c0_26 = arith.constant 0 : index
    %c6 = arith.constant 6 : index
    %c0_27 = arith.constant 0 : index
    %39 = vector.load %arg4[%c0_26, %c6, %c0_27] : memref<1x9x128xf32, #tpu.memory_space<vmem>>, vector<1x1x128xf32>
    %40 = vector.shape_cast %39 : vector<1x1x128xf32> to vector<1x128xf32>
    %41 = vector.broadcast %40 : vector<1x128xf32> to vector<8x128xf32>
    %42 = arith.mulf %38, %41 : vector<8x128xf32>
    %43 = arith.addf %36, %42 : vector<8x128xf32>
    %c112_i32_28 = arith.constant 112 : i32
    %44 = tpu.dynamic_rotate %38 by %c112_i32_28 dim 1 : vector<8x128xf32>, i32 -> vector<8x128xf32>
    %c0_29 = arith.constant 0 : index
    %c7 = arith.constant 7 : index
    %c0_30 = arith.constant 0 : index
    %45 = vector.load %arg4[%c0_29, %c7, %c0_30] : memref<1x9x128xf32, #tpu.memory_space<vmem>>, vector<1x1x128xf32>
    %46 = vector.shape_cast %45 : vector<1x1x128xf32> to vector<1x128xf32>
    %47 = vector.broadcast %46 : vector<1x128xf32> to vector<8x128xf32>
    %48 = arith.mulf %44, %47 : vector<8x128xf32>
    %49 = arith.addf %43, %48 : vector<8x128xf32>
    %c96_i32_31 = arith.constant 96 : i32
    %50 = tpu.dynamic_rotate %38 by %c96_i32_31 dim 1 : vector<8x128xf32>, i32 -> vector<8x128xf32>
    %c0_32 = arith.constant 0 : index
    %c8 = arith.constant 8 : index
    %c0_33 = arith.constant 0 : index
    %51 = vector.load %arg4[%c0_32, %c8, %c0_33] : memref<1x9x128xf32, #tpu.memory_space<vmem>>, vector<1x1x128xf32>
    %52 = vector.shape_cast %51 : vector<1x1x128xf32> to vector<1x128xf32>
    %53 = vector.broadcast %52 : vector<1x128xf32> to vector<8x128xf32>
    %54 = arith.mulf %50, %53 : vector<8x128xf32>
    %55 = arith.addf %49, %54 : vector<8x128xf32>
    %cst = arith.constant -1.280000e+02 : f32
    %cst_34 = arith.constant 1.270000e+02 : f32
    %56 = vector.broadcast %cst : f32 to vector<8x128xf32>
    %57 = arith.maximumf %56, %55 : vector<8x128xf32>
    %58 = vector.broadcast %cst_34 : f32 to vector<8x128xf32>
    %59 = arith.minimumf %58, %57 : vector<8x128xf32>
    %60 = math.roundeven %59 : vector<8x128xf32>
    %61 = arith.truncf %60 : vector<8x128xf32> to vector<8x128xbf16>
    %c0_35 = arith.constant 0 : index
    %c0_36 = arith.constant 0 : index
    %c0_37 = arith.constant 0 : index
    %c0_38 = arith.constant 0 : index
    %c0_39 = arith.constant 0 : index
    %62 = vector.load %arg5[%c0_35, %c0_36, %c0_37, %c0_38, %c0_39] : memref<1x1x1x8x128xbf16, #tpu.memory_space<vmem>>, vector<1x1x1x8x128xbf16>
    %63 = vector.shape_cast %62 : vector<1x1x1x8x128xbf16> to vector<8x128xbf16>
    %64 = vector.shape_cast %61 : vector<8x128xbf16> to vector<1x1x1x8x128xbf16>
    tpu.vector_store %arg5[%c0_35, %c0_36, %c0_37, %c0_38, %c0_39], %64 {strides = array<i32>} : memref<1x1x1x8x128xbf16, #tpu.memory_space<vmem>>, vector<1x1x1x8x128xbf16>,
    return
  }
  func.func @transform_0(%arg0: i32, %arg1: i32, %arg2: i32) -> (i32, i32, i32, i32) {
    %c0_i32 = arith.constant 0 : i32
    %c0_i32_0 = arith.constant 0 : i32
    %c0_i32_1 = arith.constant 0 : i32
    return %arg0, %arg1, %c0_i32, %c0_i32_0 : i32, i32, i32, i32
  }
  func.func @transform_1(%arg0: i32, %arg1: i32, %arg2: i32) -> (i32, i32, i32) {
    %c0_i32 = arith.constant 0 : i32
    %c0_i32_0 = arith.constant 0 : i32
    %c0_i32_1 = arith.constant 0 : i32
    return %arg2, %c0_i32, %c0_i32_0 : i32, i32, i32
  }
  func.func @transform_2(%arg0: i32, %arg1: i32, %arg2: i32) -> (i32, i32, i32, i32, i32) {
    %c0_i32 = arith.constant 0 : i32
    %c0_i32_0 = arith.constant 0 : i32
    %c0_i32_1 = arith.constant 0 : i32
    return %arg2, %arg0, %arg1, %c0_i32, %c0_i32_0 : i32, i32, i32, i32, i32
  }
}

</mosaic_0001>

<bundles_post_ra>
// kernel: tpu_custom_call.1
= control target key start
LH: loop header
LB: loop body
LE: loop exit
PB: predicated region body
PF: predicated region fallthrough
CT: control target
= control target key end

     0   :  { %7 = vsyncpa [#allocation3], 0  ;;  %s933_s0 = inlined_call_operand.vmem [shape: f32[2,1,10,128], index: 0, kind: input, shape index: {}]   ;;  %s934_s1 = inlined_call_operand.hbm [shape: f32[9,9,128], index: 1, kind: input, shape index: {}]   ;;  %s935_s2 = inlined_call_operand.hbm [shape: bf16[9,2,1,8,128], index: 2, kind: output, shape index: {}]  }
   0x1   :  { %9 = vsyncpa [#allocation3 + $0x1], 0 }
   0x2   :  { %10 = vsyncpa [#allocation4], 0 }
   0x3   :  { %12 = vsyncpa [#allocation4 + $0x1], 0  ;;  %s739_s9 = smov 0   ;;  %s741_s10 = smov 0  }
   0x4   :  { %s743_s11 = smov 0   ;;  %s745_s12 = smov 0  }
   0x5   :  { %s747_s13 = smov 0   ;;  %s749_s14 = smov 0  }
   0x6   :  { %s751_s15 = smov 0   ;;  %s753_s16 = smov 0  }
   0x7   :  { %s755_s17 = smov 0   ;;  %s757_s18 = smov 0  }
   0x8   :  { %s759_s19 = smov 0  }
   0x9 LB: > { %s426_s20 = sadd.s32 4294967295, %s716_s19   ;;  %s427_s21 = sadd.s32 4294967294, %s716_s19   ;;  %s716_s19 = sphi %s759_s19, %s18_s19   ;;  %s712_s18 = sphi %s757_s18, %s956_s18   ;;  %s708_s17 = sphi %s755_s17, %s955_s17   ;;  %s704_s16 = sphi %s753_s16, %s954_s16   ;;  %s700_s15 = sphi %s751_s15, %s953_s15   ;;  %s696_s14 = sphi %s749_s14, %s952_s14   ;;  %s692_s13 = sphi %s747_s13, %s951_s13   ;;  %s688_s12 = sphi %s745_s12, %s950_s12   ;;  %s684_s11 = sphi %s743_s11, %s949_s11   ;;  %s680_s10 = sphi %s741_s10, %s948_s10   ;;  %s676_s9 = sphi %s739_s9, %s947_s9  }
   0xa   : > { %s30_s22 = sadd.s32 1, %s708_s17  ;;  %s37_s23 = sadd.s32 1, %s712_s18 }
   0xb   : > { %p31_p0 = scmp.ge.s32.totalorder %s30_s22, 9  ;;  %s72_s24 = sadd.s32 1, %s696_s14 }
   0xc   : > { %p79_p1 = scmp.ne.s32.totalorder %s696_s14, %s692_s13  ;;  %p80_p2 = scmp.eq.s32.totalorder %s716_s19, 0 }
   0xd   : > { %s958_s22 = smov (%p31_p0, %s30_s22), 0  ;;  %s960_s23 = smov (!%p31_p0, %s37_s23), %s712_s18 }
   0xe   : > { %938 = sst [smem:[#allocation8_spill]] %s958_s22  ;;  %s69_s25 = ssub.s32 %s708_s17, %s958_s22 }
   0xf   : > { %p805_p3 = por %p80_p2, %p79_p1  ;;  %p39_p4 = scmp.ge.s32.totalorder %s960_s23, 2 }
  0x10   : > { %p70_p5 = scmp.eq.s32.totalorder %s69_s25, 0  ;;  %p85_p6 = scmp.ne.s32.totalorder %s692_s13, %s688_s12 }
  0x11   : > { %p86_p7 = scmp.eq.s32.totalorder %s426_s20, 0  ;;  %s962_s23 = smov (%p39_p4, %s960_s23), 0 }
  0x12   : > { %940 = sst [smem:[#allocation9_spill]] %s962_s23  ;;  %s96_s29 = ssub.s32 %s712_s18, %s962_s23 }
  0x13   : > { %s813_s27 = scalar_select %p70_p5, %s696_s14, %s72_s24  }
  0x14   : > { %p815_p8 = por %p86_p7, %p85_p6  ;;  %s97_s30 = sor.u32 %s96_s29, %s69_s25 }
  0x15   : > { %s102_s3 = sadd.s32 1, %s684_s11  ;;  %p100_p9 = scmp.eq.s32.totalorder %s97_s30, 0 }
  0x16   : > { %p112_p10 = scmp.ne.s32.totalorder %s684_s11, %s680_s10  ;;  %p113_p11 = scmp.eq.s32.totalorder %s426_s20, 17 }
  0x17   : > { %p118_p12 = scmp.ne.s32.totalorder %s680_s10, %s676_s9  ;;  %p119_p0 = scmp.eq.s32.totalorder %s427_s21, 17 }
  0x18   : > { %s827_s4 = scalar_select %p100_p9, %s684_s11, %s102_s3  }
  0x19   : > { %p829_p13 = por %p113_p11, %p112_p10  ;;  %p474_p1 = scmp.lt.s32.totalorder %s716_s19, 18 }
  0x1a   : > { %p834_p2 = por %p119_p0, %p118_p12  ;;  %s151_s7 = sand.u32 1, %s696_s14  }
  0x1b   : > { %s430_s8 = sshll.u32 %s151_s7, 4  ;;  %s452_s12 = sshll.u32 %s708_s17, 8 }
  0x1c   : > { %s161_s20 = scalar_lea.hbm %s934_s1, %s452_s12  ;;  %s155_s29 = scalar_lea.vmem [#allocation2], %s430_s8 }
  0x1d   : > { %s162_s30 = sshll.u32 %s155_s29, 4  ;;  %p845_p4 = pnand %p474_p1, %p805_p3  ;;  %s163_s30 = int_to_ptr.vmem [resolvable:$true] %s162_s30 }
  0x1e   : > { %p433_p5 = scmp.ge.s32.totalorder %s716_s19, 1  ;;  %s152_s21 = scalar_lea.sflag [#allocation3], %s151_s7 }
  0x1f   : > { %p570_p6 = pneg %p845_p4  ;;  %s581_s23 = scalar_lea.vmem %s163_s30, 256 }
  0x20   : > { %p582_p7 = scmp.ne.s32.totalorder %s163_s30, %s581_s23  ;;  %s718_s22 = smov [#allocation2]  }
  0x21   : > { %s586_s24 = sshll.u32 %s718_s22, 4  ;;  %s587_s24 = int_to_ptr.vmem [resolvable:$false] %s586_s24 }
  0x22   : > { %p584_p9 = pnand %p582_p7, %p570_p6  ;;  %s588_s8 = scalar_lea.vmem %s587_s24, 512 }
  0x23   : > { %p589_p11 = scmp.lt.s32.totalorder %s163_s30, %s587_s24  ;;  %p590_p12 = scmp.lt.s32.totalorder %s588_s8, %s581_s23 }
  0x24   : > { %p585_p10 = pneg %p584_p9 }
  0x25   : > { %p591_p0 = por %p590_p12, %p589_p11 }
  0x27   : > { %p592_p3 = pnand %p591_p0, %p585_p10 }
  0x29   : > { %595 = shalt.err (!%p592_p3)
}
  0x2a   : > { %s719_s26 = smov 128   ;;  %s720_s7 = smov 8  }
  0x2b   : > { %469 = dma.hbm_to_vmem [thread:$0]  (!%p845_p4), %s161_s20, 256, %s163_s30, %s152_s21, %s719_s26, %s719_s26, %s720_s7  }
  0x2c   : > { %p170_p1 = scmp.lt.s32.totalorder %s716_s19, 19 }
  0x2e   : > { %p171_p6 = pnand %p433_p5, %p170_p1 }
  0x2f   : > { %s176_s22 = sand.u32 (!%p171_p6), 1, %s692_s13  }
  0x30   : > { %174 = sbr.rel (%p171_p6) target bundleno = 224 (0xe0), region = 28  ;;  %s434_s12 = sshll.u32 (!%p171_p6), %s176_s22, 4 }
  0x31   : > { %s177_s25 = scalar_lea.sflag (!%p171_p6), [#allocation3], %s176_s22  ;;  %s858_s23 = scalar_lea.vmem (!%p171_p6), [#allocation2], %s434_s12 }
  0x35   : > { %667 = dma.done.wait (%p815_p8), %s177_s25, 256  }
  0x36   : > { %669 = vsyncadd (%p815_p8), %s177_s25, 4294967040  ;;  %p210_p4 = scmp.lt.s32.totalorder %s704_s16, 1  ;;  %s721_s24 = smov 112   ;;  %v438_v3 = vld [vmem:[%s858_s23] ss:$0 sm:$0xff] }
  0x37   : > { %s722_s28 = smov 96   ;;  %v439_v4 = vld [vmem:[%s858_s23 + $0x1] ss:$0 sm:$0xff]  ;;  %v441_v9 = vld [vmem:[%s858_s23 + $0x3] ss:$0 sm:$0xff]  ;;  %s207_s8 = sand.u32 1, %s680_s10  }
  0x38   : > { %s211_s20 = scalar_select %p210_p4, %s704_s16, 1  ;;  %v440_v10 = vld [vmem:[%s858_s23 + $0x2] ss:$0 sm:$0xff]  ;;  %v442_v15 = vld [vmem:[%s858_s23 + $0x4] ss:$0 sm:$0xff] }
  0x39   : > { %v443_v16 = vld [vmem:[%s858_s23 + $0x5] ss:$0 sm:$0xff]  ;;  %v444_v19 = vld [vmem:[%s858_s23 + $0x6] ss:$0 sm:$0xff]  ;;  %v445_v23 = vld [vmem:[%s858_s23 + $0x7] ss:$0 sm:$0xff] }
  0x3a   : > { %s453_s29 = sshll.u32 %s211_s20, 4  ;;  %v446_v27 = vld [vmem:[%s858_s23 + $0x8] ss:$0 sm:$0xff]  ;;  %s435_s26 = sshll.u32 %s207_s8, 2 }
  0x3b   : > { %s218_s21 = scalar_lea.vmem %s933_s0, %s453_s29  ;;  %s448_s7 = sshll.u32 %s700_s15, 1 }
  0x3c   : > { %v219_v0 = vld [vmem:[%s218_s21] sm:$0xff]  ;;  %s314_s22 = sadd.s32 %s704_s16, %s448_s7  ;;  %s209_s25 = scalar_lea.vmem [#allocation5], %s435_s26 }
  0x3d   : > { %v244_v1 = vld [vmem:[%s218_s21 + $0x1] sm:$0xff]  ;;  %226 = vrot.lane.b32.xlu0 %v219_v0, %s721_s24  ;;  %v225_v7 = vmul.f32 %v438_v3, %v219_v0  ;;  %s449_s12 = sshll.u32 %s314_s22, 6  ;;  %s318_s23 = sshll.u32 %s209_s25, 4  ;;  %s319_s23 = int_to_ptr.vmem [resolvable:$true] %s318_s23 }
  0x3e   : > { %252 = vrot.lane.b32.xlu1 %v244_v1, %s721_s24  ;;  %v270_v2 = vld [vmem:[%s218_s21 + $0x2] sm:$0xff]  ;;  %v250_v12 = vmul.f32 %v441_v9, %v244_v1  ;;  %s316_s30 = scalar_lea.hbm %s935_s2, %s449_s12  ;;  %s302_s15 = scalar_lea.sflag [#allocation4], %s207_s8 }
  0x3f   : > { %v276_v25 = vmul.f32 %v444_v19, %v270_v2  ;;  %s596_s3 = scalar_lea.vmem %s319_s23, 64  ;;  %s723_s16 = smov [#allocation5]  }
  0x40   : > { %p597_p8 = scmp.ne.s32.totalorder %s319_s23, %s596_s3  ;;  %s600_s21 = sshll.u32 %s723_s16, 4  ;;  %s601_s21 = int_to_ptr.vmem [resolvable:$false] %s600_s21 }
  0x41   : > { %235 = vrot.lane.b32.xlu0 %v219_v0, %s722_s28  ;;  %p603_p9 = scmp.lt.s32.totalorder %s319_s23, %s601_s21 }
  0x42   : > { %261 = vrot.lane.b32.xlu1 %v244_v1, %s722_s28  ;;  %p598_p5 = pnand %p597_p8, %p829_p13 }
  0x44   : > { %p599_p7 = pneg %p598_p5 }
  0x45   : > { %278 = vrot.lane.b32.xlu0 %v270_v2, %s721_s24  ;;  %s602_s24 = scalar_lea.vmem %s601_s21, 128 }
  0x46   : > { %287 = vrot.lane.b32.xlu1 %v270_v2, %s722_s28  ;;  %p604_p10 = scmp.lt.s32.totalorder %s602_s24, %s596_s3 }
  0x48   : > { %p605_p11 = por %p604_p10, %p603_p9 }
  0x4a   : > { %p606_p12 = pnand %p605_p11, %p599_p7 }
  0xaf   : > { %v227_v5 = vpop.permute.xlu0 %226 }
  0xb0   : > { %v253_v6 = vpop.permute.xlu1 %252  ;;  %v233_v8 = vmul.f32 %v439_v4, %v227_v5 }
  0xb1   : > { %v259_v21 = vmul.f32 %v442_v15, %v253_v6 }
  0xb2   : > { %v234_v13 = vadd.f32 %v233_v8, %v225_v7 }
  0xb3   : > { %v236_v11 = vpop.permute.xlu0 %235 }
  0xb4   : > { %v242_v14 = vmul.f32 %v440_v10, %v236_v11  ;;  %v262_v17 = vpop.permute.xlu1 %261 }
  0xb5   : > { %v268_v22 = vmul.f32 %v443_v16, %v262_v17 }
  0xb6   : > { %v243_v18 = vadd.f32 %v242_v14, %v234_v13 }
  0xb7   : > { %v279_v24 = vpop.permute.xlu0 %278 }
  0xb8   : > { %v251_v20 = vadd.f32 %v250_v12, %v243_v18  ;;  %v288_v28 = vpop.permute.xlu1 %287  ;;  %v285_v30 = vmul.f32 %v445_v23, %v279_v24 }
  0xb9   : > { %v294_v32 = vmul.f32 %v446_v27, %v288_v28 }
  0xba   : > { %v260_v26 = vadd.f32 %v259_v21, %v251_v20 }
  0xbc   : > { %v269_v29 = vadd.f32 %v268_v22, %v260_v26 }
  0xbe   : > { %v277_v31 = vadd.f32 %v276_v25, %v269_v29 }
  0xc0   : > { %v286_v33 = vadd.f32 %v285_v30, %v277_v31 }
  0xc2   : > { %v295_v34 = vadd.f32 %v294_v32, %v286_v33 }
  0xc4   : > { %v296_v35 = vmax.f32 %v295_v34, -128.0 }
  0xc6   : > { %v297_v36 = vmin.f32 %v296_v35, 127.0 }
  0xc8   : > { %v456_v37 = vcvt.f32.s32 %v297_v36  ;;  %v454_v39 = vand.u32 2147483647, %v297_v36  ;;  %v459_v41 = vand.u32 2147483648, %v297_v36 }
  0xca   : > { %v457_v38 = vcvt.s32.f32 %v456_v37  ;;  %vm455_vm0 = vcmp.lt.f32.partialorder %v454_v39, 8388608.0 }
  0xcc   : > { %v458_v40 = vand.u32 2147483647, %v457_v38 }
  0xce   : > { %v460_v42 = vor.u32 %v459_v41, %v458_v40 }
  0xd0   : > { %v461_v43 = vsel %vm455_vm0, %v460_v42, %v297_v36 }
  0xd1   : > { %v299_v44 = vpack.c.bf16 %v461_v43, %v461_v43 }
  0xd3   : > { %300 = vst [vmem:[%s209_s25] sm:$0xf] %v299_v44 }
  0xd4   : > { %609 = shalt.err (!%p606_p12)
}
  0xd5   : > { %s610_s28 = scalar_lea.hbm %s316_s30, 64  ;;  %s614_s7 = scalar_lea.hbm %s935_s2, 1152 }
  0xd6   : > { %p611_p0 = scmp.ne.s32.totalorder %s316_s30, %s610_s28  ;;  %p615_p6 = scmp.lt.s32.totalorder %s316_s30, %s935_s2 }
  0xd7   : > { %p616_p4 = scmp.lt.s32.totalorder %s614_s7, %s610_s28 }
  0xd8   : > { %p612_p3 = pnand %p611_p0, %p829_p13 }
  0xd9   : > { %p617_p8 = por %p616_p4, %p615_p6 }
  0xda   : > { %p613_p1 = pneg %p612_p3 }
  0xdc   : > { %p618_p5 = pnand %p617_p8, %p613_p1 }
  0xde   : > { %621 = shalt.err (!%p618_p5)
}
  0xdf   : > { %464 = dma.vmem_to_hbm [thread:$0]  (%p829_p13), %s319_s23, 64, %s316_s30, %s302_s15  }
  0xe0 PF: > { %p475_p7 = scmp.ge.s32.totalorder %s716_s19, 2  ;;  %s330_s25 = sand.u32 1, %s676_s9  }
  0xe1   : > { %s331_s20 = scalar_lea.sflag [#allocation4], %s330_s25 }
  0xe2   : > { %p471_p9 = pnand %p475_p7, %p834_p2 }
  0xe4   : > { %p472_p10 = pneg %p471_p9 }
  0xe6   : > { %671 = dma.done.wait (%p472_p10), %s331_s20, 64  }
  0xe7   : > { %673 = vsyncadd (%p472_p10), %s331_s20, 4294967232  ;;  %s18_s19 = sadd.s32 1, %s716_s19   ;;  %s945_s5 = sld [smem:[#allocation8_spill]] }
  0xe8   : > { %p15_p11 = scmp.ge.s32.totalorder %s18_s19, 20   ;;  %s946_s23 = sld [smem:[#allocation9_spill]] }
  0xe9   : > { %s947_s9 = smov %s680_s10  ;;  %s948_s10 = smov %s684_s11 }
  0xea   : > { %s949_s11 = smov %s827_s4  ;;  %s950_s12 = smov %s692_s13 }
  0xeb   : > { %s951_s13 = smov %s696_s14  ;;  %s952_s14 = smov %s813_s27 }
  0xec   : > { %s953_s15 = smov %s708_s17  ;;  %s954_s16 = smov %s712_s18 }
  0xed   : > { %s955_s17 = smov %s945_s5  ;;  %17 = sbr.rel (!%p15_p11) target bundleno = 9 (0x9), region = 76 }
  0xee   : > { %s956_s18 = smov %s946_s23 }
  0xf2   :  { %336 = vsyncpa [#allocation3], 1 }
  0xf3   :  { %338 = vsyncpa [#allocation3 + $0x1], 1 }
  0xf4   :  { %339 = vsyncpa [#allocation4], 1 }
  0xf5   :  { %341 = vsyncpa [#allocation4 + $0x1], 1 }

</bundles_post_ra>
